<compile_context>
chip_gen: v7x
topology: tpu7x:2x2x1
jax: 0.10.0
libtpu: 0.0.40
codegen_flags: <defaults>
</compile_context>

<pallas_src>
import functools

import jax
import jax.numpy as jnp
from jax.experimental import pallas as pl
from jax.experimental.pallas import tpu as pltpu


def _round_up(x, m):
    return ((x + m - 1) // m) * m


def mlp_kernel(x_ref, w1_ref, b1_ref, w2_ref, b2_ref, o_ref):
    # x_ref:  (TB, D_in)  batch tile (rows = batch)
    # w1_ref: (H, D_in)   fc1 weight, native PyTorch layout
    # b1_ref: (H, 1)      fc1 bias (column)
    # w2_ref: (H, 1)      fc3 weight (column) -- out_features == 1
    # b2_ref: (1, 1)      fc3 bias, scalar in SMEM
    # o_ref:  (1, TB)     lane-dense output tile (batch on the lane axis)
    x = x_ref[...].astype(jnp.float32)            # features.float()
    w1 = w1_ref[...]

    # h_t[h, b] = sum_d w1[h, d] * x[b, d]  ->  (H, TB) on the MXU.
    h = jax.lax.dot_general(
        w1, x, (((1,), (1,)), ((), ())),
        preferred_element_type=jnp.float32,
    )
    h = jnp.maximum(h + b1_ref[...], 0.0)         # bias + ReLU (VPU)

    # fc3 (single output unit): VPU multiply + sublane reduce (XLU), not MXU.
    y = jnp.sum(h * w2_ref[...], axis=0, keepdims=True) + b2_ref[0, 0]
    o_ref[...] = y.astype(o_ref.dtype)


@functools.partial(jax.jit, static_argnames=("tile_b",))
def mlp_forward(x, w1, b1, w2, b2, *, tile_b=256):
    B, D_in = x.shape
    H = w1.shape[0]
    assert tile_b % 128 == 0 and tile_b > 0

    # Effective batch tile: multiple of 128, no bigger than the padded batch.
    tb = min(tile_b, _round_up(B, 128))
    B_pad = _round_up(B, tb)
    if B_pad != B:
        x = jnp.pad(x, ((0, B_pad - B), (0, 0)))

    grid = (B_pad // tb,)
    out_row = pl.pallas_call(
        mlp_kernel,
        out_shape=jax.ShapeDtypeStruct((1, B_pad), jnp.float32),
        grid_spec=pltpu.PrefetchScalarGridSpec(
            num_scalar_prefetch=0,
            grid=grid,
            in_specs=[
                pl.BlockSpec((tb, D_in), lambda i: (i, 0)),          # x tile
                pl.BlockSpec((H, D_in), lambda i: (0, 0)),           # W1 (resident)
                pl.BlockSpec((H, 1), lambda i: (0, 0)),              # b1 (resident)
                pl.BlockSpec((H, 1), lambda i: (0, 0)),              # w2 (resident)
                pl.BlockSpec(memory_space=pltpu.MemorySpace.SMEM),   # b2 scalar
            ],
            out_specs=pl.BlockSpec((1, tb), lambda i: (0, i)),
        ),
        compiler_params=pltpu.CompilerParams(
            dimension_semantics=("parallel",),      # shard batch grid across TCs (v7x)
            vmem_limit_bytes=48 * 1024 * 1024,      # headroom for large tiles, < 64 MiB
        ),
    )(x, w1, b1, w2, b2)

    return out_row[0, :B][:, None]                  # back to (B, 1)


def init_mlp_params(key, input_size):
    """Deterministic init mimicking PyTorch nn.Linear default (uniform +-1/sqrt(fan_in))."""
    output_size = 1
    hidden_size = (input_size + output_size) // 2

    k1, k2, k3, k4 = jax.random.split(key, 4)

    bound1 = 1.0 / jnp.sqrt(jnp.float32(input_size))
    w1 = jax.random.uniform(k1, (hidden_size, input_size), jnp.float32, -bound1, bound1)
    b1 = jax.random.uniform(k2, (hidden_size,), jnp.float32, -bound1, bound1)

    bound2 = 1.0 / jnp.sqrt(jnp.float32(hidden_size))
    w2 = jax.random.uniform(k3, (output_size, hidden_size), jnp.float32, -bound2, bound2)
    b2 = jax.random.uniform(k4, (output_size,), jnp.float32, -bound2, bound2)

    return (
        w1,                                   # (H, D_in) native nn.Linear layout
        b1.reshape(hidden_size, 1),           # (H, 1)
        w2.T,                                 # (H, 1) == fc3.weight.T
        b2.reshape(1, 1),                     # (1, 1)
    )


def mlp_ref(x, w1, b1, w2, b2):
    """Pure-JAX reference matching the PyTorch forward."""
    h = jnp.maximum(x.astype(jnp.float32) @ w1.T + b1.T, 0.0)
    return h @ w2 + b2


if __name__ == "__main__":
    key = jax.random.PRNGKey(0)
    kx, kp, kx2 = jax.random.split(key, 3)

    batch = 8
    input_size = 32

    x = jax.random.normal(kx, (batch, input_size), dtype=jnp.float32)
    w1, b1, w2, b2 = init_mlp_params(kp, input_size)

    out = jax.block_until_ready(mlp_forward(x, w1, b1, w2, b2))
    ref = mlp_ref(x, w1, b1, w2, b2)
    assert out.shape == (batch, 1)
    assert jnp.allclose(out, ref, atol=1e-4, rtol=1e-4), "mismatch vs reference (small batch)"

    # Also exercise the padded, multi-tile grid path.
    batch2 = 300
    x2 = jax.random.normal(kx2, (batch2, input_size), dtype=jnp.float32)
    out2 = jax.block_until_ready(mlp_forward(x2, w1, b1, w2, b2, tile_b=256))
    ref2 = mlp_ref(x2, w1, b1, w2, b2)
    assert out2.shape == (batch2, 1)
    assert jnp.allclose(out2, ref2, atol=1e-4, rtol=1e-4), "mismatch vs reference (multi-tile)"

    print("KERNEL_OK")
</pallas_src>

<mosaic_0001>
module attributes {stable_mosaic.version = 11 : i64} {
  func.func @mlp_kernel(%arg0: i32, %arg1: memref<128x32xf32, #tpu.memory_space<vmem>>, %arg2: memref<16x32xf32, #tpu.memory_space<vmem>>, %arg3: memref<16x1xf32, #tpu.memory_space<vmem>>, %arg4: memref<16x1xf32, #tpu.memory_space<vmem>>, %arg5: memref<1x1xf32, #tpu.memory_space<smem>>, %arg6: memref<1x128xf32, #tpu.memory_space<vmem>>) attributes {dimension_semantics = [#tpu.dimension_semantics<parallel>], iteration_bounds = array<i64: 1>, scalar_prefetch = 0 : i64, scratch_operands = 0 : i64, tpu.core_type = #tpu.core_type<tc>, window_params = [{transform_indices = @transform_0, window_bounds = array<i64: 128, 32>}, {pipeline_mode = #tpu.pipeline_mode<synchronous>, transform_indices = @transform_1, window_bounds = array<i64: 16, 32>}, {pipeline_mode = #tpu.pipeline_mode<synchronous>, transform_indices = @transform_2, window_bounds = array<i64: 16, 1>}, {pipeline_mode = #tpu.pipeline_mode<synchronous>, transform_indices = @transform_3, window_bounds = array<i64: 16, 1>}, {transform_indices = @transform_4, window_bounds = array<i64: 1, 1>}, {transform_indices = @transform_5, window_bounds = array<i64: 1, 128>}]} {
    %c0 = arith.constant 0 : index
    %c0_0 = arith.constant 0 : index
    %0 = vector.load %arg1[%c0, %c0_0] : memref<128x32xf32, #tpu.memory_space<vmem>>, vector<128x32xf32>
    %c0_1 = arith.constant 0 : index
    %c0_2 = arith.constant 0 : index
    %1 = vector.load %arg2[%c0_1, %c0_2] : memref<16x32xf32, #tpu.memory_space<vmem>>, vector<16x32xf32>
    %cst = arith.constant dense<0.000000e+00> : vector<16x128xf32>
    %2 = tpu.matmul %1, %0, %cst {dimension_numbers = #tpu.dot_dimension_numbers<[1], [1], [0], [0], [0, 0, 1, 0], [], []>} : vector<16x32xf32>, vector<128x32xf32>, vector<16x128xf32> -> vector<16x128xf32>
    %c0_3 = arith.constant 0 : index
    %c0_4 = arith.constant 0 : index
    %3 = vector.load %arg3[%c0_3, %c0_4] : memref<16x1xf32, #tpu.memory_space<vmem>>, vector<16x1xf32>
    %4 = vector.broadcast %3 : vector<16x1xf32> to vector<16x128xf32>
    %5 = arith.addf %2, %4 : vector<16x128xf32>
    %cst_5 = arith.constant 0.000000e+00 : f32
    %6 = vector.broadcast %cst_5 : f32 to vector<16x128xf32>
    %7 = arith.maximumf %5, %6 : vector<16x128xf32>
    %c0_6 = arith.constant 0 : index
    %c0_7 = arith.constant 0 : index
    %8 = vector.load %arg4[%c0_6, %c0_7] : memref<16x1xf32, #tpu.memory_space<vmem>>, vector<16x1xf32>
    %9 = vector.broadcast %8 : vector<16x1xf32> to vector<16x128xf32>
    %10 = arith.mulf %7, %9 : vector<16x128xf32>
    %cst_8 = arith.constant dense<0.000000e+00> : vector<128xf32>
    %11 = vector.multi_reduction <add>, %10, %cst_8 [0] : vector<16x128xf32> to vector<128xf32>
    %12 = vector.shape_cast %11 : vector<128xf32> to vector<1x128xf32>
    %c0_9 = arith.constant 0 : index
    %c0_10 = arith.constant 0 : index
    %13 = memref.load %arg5[%c0_9, %c0_10] : memref<1x1xf32, #tpu.memory_space<smem>>
    %14 = vector.broadcast %13 : f32 to vector<1x128xf32>
    %15 = arith.addf %12, %14 : vector<1x128xf32>
    %c0_11 = arith.constant 0 : index
    %c0_12 = arith.constant 0 : index
    %16 = vector.load %arg6[%c0_11, %c0_12] : memref<1x128xf32, #tpu.memory_space<vmem>>, vector<1x128xf32>
    tpu.vector_store %arg6[%c0_11, %c0_12], %15 {strides = array<i32>} : memref<1x128xf32, #tpu.memory_space<vmem>>, vector<1x128xf32>,
    return
  }
  func.func @transform_0(%arg0: i32) -> (i32, i32) {
    %c0_i32 = arith.constant 0 : i32
    %c0_i32_0 = arith.constant 0 : i32
    return %arg0, %c0_i32 : i32, i32
  }
  func.func @transform_1(%arg0: i32) -> (i32, i32) {
    %c0_i32 = arith.constant 0 : i32
    %c0_i32_0 = arith.constant 0 : i32
    %c0_i32_1 = arith.constant 0 : i32
    return %c0_i32, %c0_i32_0 : i32, i32
  }
  func.func @transform_2(%arg0: i32) -> (i32, i32) {
    %c0_i32 = arith.constant 0 : i32
    %c0_i32_0 = arith.constant 0 : i32
    %c0_i32_1 = arith.constant 0 : i32
    return %c0_i32, %c0_i32_0 : i32, i32
  }
  func.func @transform_3(%arg0: i32) -> (i32, i32) {
    %c0_i32 = arith.constant 0 : i32
    %c0_i32_0 = arith.constant 0 : i32
    %c0_i32_1 = arith.constant 0 : i32
    return %c0_i32, %c0_i32_0 : i32, i32
  }
  func.func @transform_4(%arg0: i32) -> (i32, i32) {
    %c0_i32 = arith.constant 0 : i32
    %c0_i32_0 = arith.constant 0 : i32
    %c0_i32_1 = arith.constant 0 : i32
    return %c0_i32, %c0_i32_0 : i32, i32
  }
  func.func @transform_5(%arg0: i32) -> (i32, i32) {
    %c0_i32 = arith.constant 0 : i32
    %c0_i32_0 = arith.constant 0 : i32
    return %c0_i32, %arg0 : i32, i32
  }
}

</mosaic_0001>

<bundles_post_ra>
// kernel: mlp_forward.1
= control target key start
LH: loop header
LB: loop body
LE: loop exit
PB: predicated region body
PF: predicated region fallthrough
CT: control target
= control target key end

     0   :  { %vm51_vm0 = vcmask 261120   ;;  %v334_v3 = vmov 0   ;;  %s477_s0 = inlined_call_operand.vmem [shape: f32[128,32], index: 0, kind: input, shape index: {}]   ;;  %s478_s1 = inlined_call_operand.vmem [shape: f32[16,32], index: 1, kind: input, shape index: {}]   ;;  %s479_s2 = inlined_call_operand.vmem [shape: f32[16,1], index: 2, kind: input, shape index: {}]   ;;  %s480_s3 = inlined_call_operand.vmem [shape: f32[16,1], index: 3, kind: input, shape index: {}]   ;;  %s481_s4 = inlined_call_operand.<no memory space> [shape: f32[1,1], index: 4, kind: input, shape index: {}]   ;;  %s482_s5 = inlined_call_operand.vmem [shape: f32[1,128], index: 5, kind: output, shape index: {}]  }
   0x1   :  { %v21_v0 = vld [vmem:[%s477_s0] sm:$0xff]  ;;  %v22_v1 = vld [vmem:[%s477_s0 + $0x8] sm:$0xff]  ;;  %vm373_vm1 = vmpackc.low %vm51_vm0, %vm51_vm0  ;;  %332 = vset.pattern.permute.xlu0 %v334_v3  ;;  %333 = vset.pattern.permute.xlu1 %v334_v3  ;;  %v205_v50 = vstv %s481_s4 }
   0x2   :  { %v283_v4 = vpack.c.bf16 %v22_v1, %v21_v0  ;;  %v23_v5 = vld [vmem:[%s477_s0 + $0x10] sm:$0xff]  ;;  %v24_v6 = vld [vmem:[%s477_s0 + $0x18] sm:$0xff]  ;;  %v25_v8 = vld [vmem:[%s477_s0 + $0x20] sm:$0xff] }
   0x3   :  { %v289_v7 = vpack.c.bf16 %v24_v6, %v23_v5  ;;  %v37_v9 = vld [vmem:[%s478_s1] sm:$0xff]  ;;  %v26_v10 = vld [vmem:[%s477_s0 + $0x28] sm:$0xff]  ;;  %v27_v16 = vld [vmem:[%s477_s0 + $0x30] sm:$0xff] }
   0x4   :  { %285 = vmatprep.subr.msk.bf16.mxu0 %vm373_vm1, %v283_v4  ;;  %280 = vmatprep.mubr.msk.f32.mxu0 %vm51_vm0, %v37_v9  ;;  %v39_v11 = vld [vmem:[%s479_s2] sm:$0xff]  ;;  %v40_v13 = vld [vmem:[%s479_s2 + $0x8] sm:$0xff]  ;;  %v295_v15 = vpack.c.bf16 %v26_v10, %v25_v8  ;;  %v28_v17 = vld [vmem:[%s477_s0 + $0x38] sm:$0xff] }
   0x5   :  { %288 = vmatpush3.bf16.xpose.msk.msra.mxu0 %vm373_vm1, %v283_v4  ;;  %v183_v12 = vld [vmem:[%s480_s3] sm:$0xff]  ;;  %43 = vperm.xlu0 %332, %v39_v11   ;;  %v184_v14 = vld [vmem:[%s480_s3 + $0x8] sm:$0xff]  ;;  %v301_v18 = vpack.c.bf16 %v28_v17, %v27_v16  ;;  %v31_v22 = vld [vmem:[%s477_s0 + $0x50] sm:$0xff] }
   0x6   :  { %291 = vmatprep.subr.msk.bf16.mxu0 %vm373_vm1, %v289_v7  ;;  %187 = vperm.xlu1 %333, %v183_v12   ;;  %v29_v19 = vld [vmem:[%s477_s0 + $0x40] sm:$0xff]  ;;  %v30_v20 = vld [vmem:[%s477_s0 + $0x48] sm:$0xff]  ;;  %v32_v23 = vld [vmem:[%s477_s0 + $0x58] sm:$0xff] }
   0x7   :  { %v307_v21 = vpack.c.bf16 %v30_v20, %v29_v19  ;;  %v313_v24 = vpack.c.bf16 %v32_v23, %v31_v22  ;;  %v33_v25 = vld [vmem:[%s477_s0 + $0x60] sm:$0xff]  ;;  %v34_v26 = vld [vmem:[%s477_s0 + $0x68] sm:$0xff]  ;;  %v35_v28 = vld [vmem:[%s477_s0 + $0x70] sm:$0xff] }
   0x8   :  { %v319_v27 = vpack.c.bf16 %v34_v26, %v33_v25  ;;  %v36_v29 = vld [vmem:[%s477_s0 + $0x78] sm:$0xff]  ;;  %v38_v31 = vld [vmem:[%s478_s1 + $0x8] sm:$0xff] }
   0x9   :  { %48 = vperm.xlu0 %332, %v40_v13   ;;  %v325_v30 = vpack.c.bf16 %v36_v29, %v35_v28 }
   0xa   :  { %192 = vperm.xlu1 %333, %v184_v14  }
   0xd   :  { %294 = vmatpush3.bf16.xpose.msk.msra.mxu0 %vm373_vm1, %v289_v7 }
   0xe   :  { %297 = vmatprep.subr.msk.bf16.mxu0 %vm373_vm1, %v295_v15 }
  0x15   :  { %300 = vmatpush3.bf16.xpose.msk.msra.mxu0 %vm373_vm1, %v295_v15 }
  0x16   :  { %303 = vmatprep.subr.msk.bf16.mxu0 %vm373_vm1, %v301_v18 }
  0x1d   :  { %306 = vmatpush3.bf16.xpose.msk.msra.mxu0 %vm373_vm1, %v301_v18 }
  0x1e   :  { %309 = vmatprep.subr.msk.bf16.mxu0 %vm373_vm1, %v307_v21 }
  0x25   :  { %312 = vmatpush3.bf16.xpose.msk.msra.mxu0 %vm373_vm1, %v307_v21 }
  0x26   :  { %315 = vmatprep.subr.msk.bf16.mxu0 %vm373_vm1, %v313_v24 }
  0x2d   :  { %318 = vmatpush3.bf16.xpose.msk.msra.mxu0 %vm373_vm1, %v313_v24 }
  0x2e   :  { %321 = vmatprep.subr.msk.bf16.mxu0 %vm373_vm1, %v319_v27 }
  0x35   :  { %324 = vmatpush3.bf16.xpose.msk.msra.mxu0 %vm373_vm1, %v319_v27 }
  0x36   :  { %327 = vmatprep.subr.msk.bf16.mxu0 %vm373_vm1, %v325_v30 }
  0x3d   :  { %330 = vmatpush3.bf16.xpose.msk.msra.mxu0 %vm373_vm1, %v325_v30 }
  0x44   :  { %281 = vmatmul.mubr.msk.f32.vlgmr.msra.gmra.mrb[0].mxu0 %vm51_vm0, %v38_v31 }
  0x84   :  { %v44_v32 = vpop.permute.xlu0 %43 }
  0x85   :  { %v188_v33 = vpop.permute.xlu1 %187 }
  0x88   :  { %v49_v34 = vpop.permute.xlu0 %48 }
  0x89   :  { %v193_v40 = vpop.permute.xlu1 %192 }
 0x117   :  { %v282_v35 = vpop.f32.mrb[0].mxu0 }
 0x118   :  { %v178_v36 = vadd.f32 %v282_v35, %v49_v34  ;;  %v172_v37 = vpop.f32.mrb[1].mxu0 }
 0x119   :  { %v173_v38 = vadd.f32 %v172_v37, %v44_v32 }
 0x11a   :  { %v182_v39 = vmax.f32 %v178_v36, 0.0 }
 0x11b   :  { %v181_v41 = vmax.f32 %v173_v38, 0.0 }
 0x11c   :  { %v196_v42 = vmul.f32 %v193_v40, %v182_v39 }
 0x11d   :  { %v195_v43 = vmul.f32 %v188_v33, %v181_v41 }
 0x11f   :  { %v197_v44 = vadd.f32 %v196_v42, %v195_v43 }
 0x121   :  { %v198_v45 = vrot.slane %v197_v44, 4 }
 0x123   :  { %v199_v46 = vadd.f32 %v198_v45, %v197_v44 }
 0x125   :  { %v200_v47 = vrot.slane %v199_v46, 2 }
 0x127   :  { %v201_v48 = vadd.f32 %v200_v47, %v199_v46 }
 0x129   :  { %v202_v49 = vrot.slane %v201_v48, 1 }
 0x12b   :  { %v203_v51 = vadd.f32 %v202_v49, %v201_v48 }
 0x12d   :  { %v206_v52 = vadd.f32 %v205_v50, %v203_v51 }
 0x12f   :  { %207 = vst [vmem:[%s482_s5] sm:$0x1] %v206_v52 }

</bundles_post_ra>
